<compile_context>
chip_gen: v7x
topology: tpu7x:2x2x1
jax: 0.10.0
libtpu: 0.0.40
codegen_flags: <defaults>
</compile_context>

<pallas_src>
import numpy as np
import jax
import jax.numpy as jnp
from jax.experimental import pallas as pl
from jax.experimental.pallas import tpu as pltpu

REDUCTION = 16.0                 # faster_rcnn.reduction (feature stride)
R = 8                            # number of (post-NMS) proposals per image
C = 4                            # background + 3 foreground classes
TOP, LEFT, BOTTOM, RIGHT = 0, 1, 2, 3
HEAD_DIM = 4 * R + 4 * R + C * R + C * R   # = 128 -> lane-dense output width
SUBLANE = 8                      # pad batch (M) to the 8-sublane granule


# ----------------------------------------------------------------------------
# Fused kernel: matmul head + synthetic decode + predictor hot path
# ----------------------------------------------------------------------------
def _fused_kernel(x_ref, w_ref, o_ref):
    """x_ref: (Bp, K) padded batch.  w_ref: (K, 128).  o_ref: (Bp, 128).

    Head column layout (coordinate-major / class-major, chosen kernel-friendly):
      h[:,  0: 32]  raw box params  [c0(R) | c1(R) | c2(R) | c3(R)]
      h[:, 32: 64]  rcnn_reg (x0.1) [top(R)| left(R)| bottom(R)| right(R)]
      h[:, 64: 96]  rcnn_cls logits [cls0(R)| cls1(R)| cls2(R)| cls3(R)]
      h[:, 96:128]  nms_cls         [cls0(R)| cls1(R)| cls2(R)| cls3(R)]

    Output slab layout (lane-dense, width 128):
      cols   0: 32  nms_reg        coordinate-major
      cols  32: 64  nms_cls        class-major (pass-through)
      cols  64: 96  rcnn_reg_out   (rcnn_reg + rounded nms_reg), coord-major
      cols  96:128  rcnn_cls_out   softmax(rcnn_cls), class-major
    """
    # NOTE: at K=1024 a monolithic (K,N) block is fine (<1 MiB VMEM incl.
    # double-buffering).  If feat_dim grows to real backbone sizes, add a K
    # grid axis + f32 VMEM accumulator (pl.when init/writeback) instead.
    h = jnp.dot(x_ref[...], w_ref[...], preferred_element_type=jnp.float32)

    # --- synthetic faster_rcnn head decode (plausible boxes: t<b, l<r) ------
    a = jnp.abs(h[:, 0:4 * R])
    ctr_t  = a[:, 0 * R:1 * R] * 2.0 + 4.0
    ctr_l  = a[:, 1 * R:2 * R] * 2.0 + 4.0
    half_h = a[:, 2 * R:3 * R] + 2.0
    half_w = a[:, 3 * R:4 * R] + 2.0
    nms_top, nms_left = ctr_t - half_h, ctr_l - half_w
    nms_bottom, nms_right = ctr_t + half_h, ctr_l + half_w

    rcnn_reg = h[:, 4 * R:8 * R] * 0.1                   # coord-major (Bp, 4R)
    rcnn_cls = h[:, 8 * R:8 * R + C * R]                 # class-major (Bp, CR)
    nms_cls  = h[:, 8 * R + C * R:8 * R + 2 * C * R]     # class-major (Bp, CR)

    # --- FasterRCNNPredictor hot path --------------------------------------
    # floor for top/left, ceil for bottom/right (static slices, no iota/where)
    r_top    = jnp.floor(nms_top * REDUCTION) / REDUCTION
    r_left   = jnp.floor(nms_left * REDUCTION) / REDUCTION
    r_bottom = jnp.ceil(nms_bottom * REDUCTION) / REDUCTION
    r_right  = jnp.ceil(nms_right * REDUCTION) / REDUCTION
    # (nms_height / nms_width in the reference are dead code; not materialized)
    rounded = jnp.concatenate([r_top, r_left, r_bottom, r_right], axis=1)
    rcnn_reg_out = rcnn_reg + rounded

    # numerically stable softmax over the C class blocks (class-major slices)
    logits = [rcnn_cls[:, k * R:(k + 1) * R] for k in range(C)]
    m = logits[0]
    for k in range(1, C):
        m = jnp.maximum(m, logits[k])
    exps = [jnp.exp(l - m) for l in logits]
    denom = exps[0]
    for k in range(1, C):
        denom = denom + exps[k]
    # exact divide kept so the sum-to-1 check holds at atol=1e-5
    probs = jnp.concatenate([e / denom for e in exps], axis=1)

    nms_reg = jnp.concatenate([nms_top, nms_left, nms_bottom, nms_right],
                              axis=1)

    # single unmasked lane-dense store of the whole (Bp, 128) slab
    o_ref[...] = jnp.concatenate([nms_reg, nms_cls, rcnn_reg_out, probs],
                                 axis=1)


def fused_predictor_head(x_pad, w_head):
    Bp, K = x_pad.shape
    N = w_head.shape[1]
    return pl.pallas_call(
        _fused_kernel,
        out_shape=jax.ShapeDtypeStruct((Bp, N), jnp.float32),
        grid=(1,),
        in_specs=[pl.BlockSpec((Bp, K), lambda i: (0, 0)),
                  pl.BlockSpec((K, N), lambda i: (0, 0))],
        out_specs=pl.BlockSpec((Bp, N), lambda i: (0, 0)),
        compiler_params=pltpu.CompilerParams(
            dimension_semantics=("arbitrary",)),
    )(x_pad, w_head)


# ----------------------------------------------------------------------------
# Host-side glue: per-class greedy NMS (data-dependent output shapes)
# ----------------------------------------------------------------------------
def _nms_numpy(boxes, scores, iou_threshold):
    if boxes.shape[0] == 0:
        return np.zeros((0,), dtype=np.int64)
    t, l, b, r = boxes[:, 0], boxes[:, 1], boxes[:, 2], boxes[:, 3]
    areas = (b - t) * (r - l)
    order = np.argsort(-scores)
    keep = []
    while order.size > 0:
        i = order[0]
        keep.append(i)
        if order.size == 1:
            break
        rest = order[1:]
        tt = np.maximum(t[i], t[rest])
        ll = np.maximum(l[i], l[rest])
        bb = np.minimum(b[i], b[rest])
        rr = np.minimum(r[i], r[rest])
        inter = np.clip(bb - tt, 0, None) * np.clip(rr - ll, 0, None)
        iou = inter / (areas[i] + areas[rest] - inter + 1e-9)
        order = rest[iou <= iou_threshold]
    return np.array(keep, dtype=np.int64)


def faster_rcnn_predictor_forward(img, img_id, w_head):
    del img_id                       # unused by the synthetic backbone
    B = img.shape[0]
    x = img.reshape(B, -1).astype(jnp.float32)
    Bp = ((B + SUBLANE - 1) // SUBLANE) * SUBLANE
    x_pad = jnp.pad(x, ((0, Bp - B), (0, 0)))

    slab = fused_predictor_head(x_pad, w_head)           # (Bp, 128)
    valid = slab[:B]

    def coord_major_to_brc(flat):    # (B, 4R) -> (B, R, 4) [top,left,bot,right]
        return jnp.transpose(flat.reshape(B, 4, R), (0, 2, 1))

    def class_major_to_brc(flat):    # (B, CR) -> (B, R, C)
        return jnp.transpose(flat.reshape(B, C, R), (0, 2, 1))

    nms_reg  = coord_major_to_brc(valid[:, 0 * R:4 * R])
    nms_cls  = class_major_to_brc(valid[:, 4 * R:8 * R])
    rcnn_reg = coord_major_to_brc(valid[:, 8 * R:12 * R])
    rcnn_cls = class_major_to_brc(valid[:, 12 * R:16 * R])

    # TODO(synk): the ragged per-image/per-class boolean gather +
    # torchvision.ops.nms has no fixed-shape Pallas equivalent; it runs as a
    # host numpy loop after a single device_get sync.
    reg_np, cls_np = jax.device_get((rcnn_reg, rcnn_cls))
    reg_np, cls_np = np.asarray(reg_np), np.asarray(cls_np)

    reg_list, cls_list = [], []
    num_class = cls_np.shape[2]
    for b in range(B):
        b_reg, b_cls = reg_np[b], cls_np[b]
        argmax = np.argmax(b_cls, axis=1)
        keep = argmax != 0
        r, c, argmax = b_reg[keep], b_cls[keep], argmax[keep]
        b_r, b_c = [], []
        for class_id in range(1, num_class):
            sel = argmax == class_id
            class_c, class_r = c[sel], r[sel]
            k = _nms_numpy(class_r, class_c[:, class_id], 0.5)
            if class_c[k].shape[0] > 0:
                b_c.append(class_c[k])
                b_r.append(class_r[k])
        if b_c:
            cls_b = np.concatenate(b_c, axis=0)
            reg_b = np.concatenate(b_r, axis=0)
        else:
            cls_b = np.zeros((0, num_class), np.float32)
            reg_b = np.zeros((0, 4), np.float32)
        reg_list.append(reg_b)
        cls_list.append(cls_b)

    return nms_reg, nms_cls, rcnn_reg, rcnn_cls, reg_list, cls_list


if __name__ == "__main__":
    key = jax.random.PRNGKey(0)
    k_img, k_w = jax.random.split(key)

    B, Cin, H, W = 2, 4, 16, 16
    img = jax.random.normal(k_img, (B, Cin, H, W), dtype=jnp.float32)
    img_id = jnp.arange(B, dtype=jnp.int32)

    feat_dim = Cin * H * W                               # 1024
    w_head = (jax.random.normal(k_w, (feat_dim, HEAD_DIM), dtype=jnp.float32)
              / jnp.sqrt(jnp.float32(feat_dim)))

    nms_reg, nms_cls, rcnn_reg, rcnn_cls, reg, cls = \
        faster_rcnn_predictor_forward(img, img_id, w_head)

    jax.block_until_ready((nms_reg, nms_cls, rcnn_reg, rcnn_cls))

    # light sanity checks
    assert nms_reg.shape == (B, R, 4)
    assert nms_cls.shape == (B, R, C)
    assert rcnn_reg.shape == (B, R, 4)
    assert rcnn_cls.shape == (B, R, C)
    probs_sum = np.asarray(jnp.sum(rcnn_cls, axis=2))
    assert np.allclose(probs_sum, 1.0, atol=1e-5)
    assert np.all(np.isfinite(np.asarray(rcnn_reg)))
    nr = np.asarray(nms_reg)
    assert np.all(nr[..., BOTTOM] > nr[..., TOP])
    assert np.all(nr[..., RIGHT] > nr[..., LEFT])
    assert len(reg) == B and len(cls) == B

    print("KERNEL_OK")
</pallas_src>

<mosaic_0001>
module attributes {stable_mosaic.version = 11 : i64} {
  func.func @_fused_kernel(%arg0: i32, %arg1: memref<8x1024xf32, #tpu.memory_space<vmem>>, %arg2: memref<1024x128xf32, #tpu.memory_space<vmem>>, %arg3: memref<8x128xf32, #tpu.memory_space<vmem>>) attributes {dimension_semantics = [#tpu.dimension_semantics<arbitrary>], iteration_bounds = array<i64: 1>, scalar_prefetch = 0 : i64, scratch_operands = 0 : i64, tpu.core_type = #tpu.core_type<tc>, window_params = [{pipeline_mode = #tpu.pipeline_mode<synchronous>, transform_indices = @transform_0, window_bounds = array<i64: 8, 1024>}, {pipeline_mode = #tpu.pipeline_mode<synchronous>, transform_indices = @transform_1, window_bounds = array<i64: 1024, 128>}, {pipeline_mode = #tpu.pipeline_mode<synchronous>, transform_indices = @transform_2, window_bounds = array<i64: 8, 128>}]} {
    %c0 = arith.constant 0 : index
    %c0_0 = arith.constant 0 : index
    %0 = vector.load %arg1[%c0, %c0_0] : memref<8x1024xf32, #tpu.memory_space<vmem>>, vector<8x1024xf32>
    %c0_1 = arith.constant 0 : index
    %c0_2 = arith.constant 0 : index
    %1 = vector.load %arg2[%c0_1, %c0_2] : memref<1024x128xf32, #tpu.memory_space<vmem>>, vector<1024x128xf32>
    %cst = arith.constant dense<0.000000e+00> : vector<8x128xf32>
    %2 = tpu.matmul %0, %1, %cst {dimension_numbers = #tpu.dot_dimension_numbers<[1], [0], [0], [1], [0, 0, 1, 1], [], []>} : vector<8x1024xf32>, vector<1024x128xf32>, vector<8x128xf32> -> vector<8x128xf32>
    %3 = vector.extract_strided_slice %2 {offsets = [0, 0], sizes = [8, 32], strides = [1, 1]} : vector<8x128xf32> to vector<8x32xf32>
    %4 = math.absf %3 : vector<8x32xf32>
    %5 = vector.extract_strided_slice %4 {offsets = [0, 0], sizes = [8, 8], strides = [1, 1]} : vector<8x32xf32> to vector<8x8xf32>
    %cst_3 = arith.constant 2.000000e+00 : f32
    %6 = vector.broadcast %cst_3 : f32 to vector<8x8xf32>
    %7 = arith.mulf %5, %6 : vector<8x8xf32>
    %cst_4 = arith.constant 4.000000e+00 : f32
    %8 = vector.broadcast %cst_4 : f32 to vector<8x8xf32>
    %9 = arith.addf %7, %8 : vector<8x8xf32>
    %10 = vector.extract_strided_slice %4 {offsets = [0, 8], sizes = [8, 8], strides = [1, 1]} : vector<8x32xf32> to vector<8x8xf32>
    %cst_5 = arith.constant 2.000000e+00 : f32
    %11 = vector.broadcast %cst_5 : f32 to vector<8x8xf32>
    %12 = arith.mulf %10, %11 : vector<8x8xf32>
    %cst_6 = arith.constant 4.000000e+00 : f32
    %13 = vector.broadcast %cst_6 : f32 to vector<8x8xf32>
    %14 = arith.addf %12, %13 : vector<8x8xf32>
    %15 = vector.extract_strided_slice %4 {offsets = [0, 16], sizes = [8, 8], strides = [1, 1]} : vector<8x32xf32> to vector<8x8xf32>
    %cst_7 = arith.constant 2.000000e+00 : f32
    %16 = vector.broadcast %cst_7 : f32 to vector<8x8xf32>
    %17 = arith.addf %15, %16 : vector<8x8xf32>
    %18 = vector.extract_strided_slice %4 {offsets = [0, 24], sizes = [8, 8], strides = [1, 1]} : vector<8x32xf32> to vector<8x8xf32>
    %cst_8 = arith.constant 2.000000e+00 : f32
    %19 = vector.broadcast %cst_8 : f32 to vector<8x8xf32>
    %20 = arith.addf %18, %19 : vector<8x8xf32>
    %21 = arith.subf %9, %17 : vector<8x8xf32>
    %22 = arith.subf %14, %20 : vector<8x8xf32>
    %23 = arith.addf %9, %17 : vector<8x8xf32>
    %24 = arith.addf %14, %20 : vector<8x8xf32>
    %25 = vector.extract_strided_slice %2 {offsets = [0, 32], sizes = [8, 32], strides = [1, 1]} : vector<8x128xf32> to vector<8x32xf32>
    %cst_9 = arith.constant 1.000000e-01 : f32
    %26 = vector.broadcast %cst_9 : f32 to vector<8x32xf32>
    %27 = arith.mulf %25, %26 : vector<8x32xf32>
    %28 = vector.extract_strided_slice %2 {offsets = [0, 64], sizes = [8, 32], strides = [1, 1]} : vector<8x128xf32> to vector<8x32xf32>
    %29 = vector.extract_strided_slice %2 {offsets = [0, 96], sizes = [8, 32], strides = [1, 1]} : vector<8x128xf32> to vector<8x32xf32>
    %cst_10 = arith.constant 1.600000e+01 : f32
    %30 = vector.broadcast %cst_10 : f32 to vector<8x8xf32>
    %31 = arith.mulf %21, %30 : vector<8x8xf32>
    %32 = math.floor %31 : vector<8x8xf32>
    %cst_11 = arith.constant 1.600000e+01 : f32
    %33 = vector.broadcast %cst_11 : f32 to vector<8x8xf32>
    %34 = arith.divf %32, %33 : vector<8x8xf32>
    %cst_12 = arith.constant 1.600000e+01 : f32
    %35 = vector.broadcast %cst_12 : f32 to vector<8x8xf32>
    %36 = arith.mulf %22, %35 : vector<8x8xf32>
    %37 = math.floor %36 : vector<8x8xf32>
    %cst_13 = arith.constant 1.600000e+01 : f32
    %38 = vector.broadcast %cst_13 : f32 to vector<8x8xf32>
    %39 = arith.divf %37, %38 : vector<8x8xf32>
    %cst_14 = arith.constant 1.600000e+01 : f32
    %40 = vector.broadcast %cst_14 : f32 to vector<8x8xf32>
    %41 = arith.mulf %23, %40 : vector<8x8xf32>
    %42 = math.ceil %41 : vector<8x8xf32>
    %cst_15 = arith.constant 1.600000e+01 : f32
    %43 = vector.broadcast %cst_15 : f32 to vector<8x8xf32>
    %44 = arith.divf %42, %43 : vector<8x8xf32>
    %cst_16 = arith.constant 1.600000e+01 : f32
    %45 = vector.broadcast %cst_16 : f32 to vector<8x8xf32>
    %46 = arith.mulf %24, %45 : vector<8x8xf32>
    %47 = math.ceil %46 : vector<8x8xf32>
    %cst_17 = arith.constant 1.600000e+01 : f32
    %48 = vector.broadcast %cst_17 : f32 to vector<8x8xf32>
    %49 = arith.divf %47, %48 : vector<8x8xf32>
    %50 = tpu.concatenate %34, %39, %44, %49 in 1 : vector<8x8xf32>, vector<8x8xf32>, vector<8x8xf32>, vector<8x8xf32> -> vector<8x32xf32>
    %51 = arith.addf %27, %50 : vector<8x32xf32>
    %52 = vector.extract_strided_slice %28 {offsets = [0, 0], sizes = [8, 8], strides = [1, 1]} : vector<8x32xf32> to vector<8x8xf32>
    %53 = vector.extract_strided_slice %28 {offsets = [0, 8], sizes = [8, 8], strides = [1, 1]} : vector<8x32xf32> to vector<8x8xf32>
    %54 = vector.extract_strided_slice %28 {offsets = [0, 16], sizes = [8, 8], strides = [1, 1]} : vector<8x32xf32> to vector<8x8xf32>
    %55 = vector.extract_strided_slice %28 {offsets = [0, 24], sizes = [8, 8], strides = [1, 1]} : vector<8x32xf32> to vector<8x8xf32>
    %56 = arith.maximumf %52, %53 : vector<8x8xf32>
    %57 = arith.maximumf %56, %54 : vector<8x8xf32>
    %58 = arith.maximumf %57, %55 : vector<8x8xf32>
    %59 = arith.subf %52, %58 : vector<8x8xf32>
    %60 = math.exp %59 : vector<8x8xf32>
    %61 = arith.subf %53, %58 : vector<8x8xf32>
    %62 = math.exp %61 : vector<8x8xf32>
    %63 = arith.subf %54, %58 : vector<8x8xf32>
    %64 = math.exp %63 : vector<8x8xf32>
    %65 = arith.subf %55, %58 : vector<8x8xf32>
    %66 = math.exp %65 : vector<8x8xf32>
    %67 = arith.addf %60, %62 : vector<8x8xf32>
    %68 = arith.addf %67, %64 : vector<8x8xf32>
    %69 = arith.addf %68, %66 : vector<8x8xf32>
    %70 = arith.divf %60, %69 : vector<8x8xf32>
    %71 = arith.divf %62, %69 : vector<8x8xf32>
    %72 = arith.divf %64, %69 : vector<8x8xf32>
    %73 = arith.divf %66, %69 : vector<8x8xf32>
    %74 = tpu.concatenate %70, %71, %72, %73 in 1 : vector<8x8xf32>, vector<8x8xf32>, vector<8x8xf32>, vector<8x8xf32> -> vector<8x32xf32>
    %75 = tpu.concatenate %21, %22, %23, %24 in 1 : vector<8x8xf32>, vector<8x8xf32>, vector<8x8xf32>, vector<8x8xf32> -> vector<8x32xf32>
    %76 = tpu.concatenate %75, %29, %51, %74 in 1 : vector<8x32xf32>, vector<8x32xf32>, vector<8x32xf32>, vector<8x32xf32> -> vector<8x128xf32>
    %c0_18 = arith.constant 0 : index
    %c0_19 = arith.constant 0 : index
    %77 = vector.load %arg3[%c0_18, %c0_19] : memref<8x128xf32, #tpu.memory_space<vmem>>, vector<8x128xf32>
    tpu.vector_store %arg3[%c0_18, %c0_19], %76 {strides = array<i32>} : memref<8x128xf32, #tpu.memory_space<vmem>>, vector<8x128xf32>,
    return
  }
  func.func @transform_0(%arg0: i32) -> (i32, i32) {
    %c0_i32 = arith.constant 0 : i32
    %c0_i32_0 = arith.constant 0 : i32
    %c0_i32_1 = arith.constant 0 : i32
    return %c0_i32, %c0_i32_0 : i32, i32
  }
  func.func @transform_1(%arg0: i32) -> (i32, i32) {
    %c0_i32 = arith.constant 0 : i32
    %c0_i32_0 = arith.constant 0 : i32
    %c0_i32_1 = arith.constant 0 : i32
    return %c0_i32, %c0_i32_0 : i32, i32
  }
  func.func @transform_2(%arg0: i32) -> (i32, i32) {
    %c0_i32 = arith.constant 0 : i32
    %c0_i32_0 = arith.constant 0 : i32
    %c0_i32_1 = arith.constant 0 : i32
    return %c0_i32, %c0_i32_0 : i32, i32
  }
}

</mosaic_0001>

<bundles_post_ra>
// kernel: tpu_custom_call.1
= control target key start
LH: loop header
LB: loop body
LE: loop exit
PB: predicated region body
PF: predicated region fallthrough
CT: control target
= control target key end

     0   :  { %7 = vsyncpa [#allocation3], 0  ;;  %s1088_s0 = inlined_call_operand.hbm [shape: f32[8,1024], index: 0, kind: input, shape index: {}]   ;;  %s1089_s1 = inlined_call_operand.hbm [shape: f32[1024,128], index: 1, kind: input, shape index: {}]   ;;  %s1090_s2 = inlined_call_operand.hbm [shape: f32[8,128], index: 2, kind: output, shape index: {}]  }
   0x1   :  { %8 = vsyncpa [#allocation6], 0 }
   0x2   :  { %9 = vsyncpa [#allocation4], 0  ;;  %s982_s9 = smov [#allocation2]   ;;  %s983_s11 = smov [#allocation5]  }
   0x3   :  { %s16_s10 = sshll.u32 %s982_s9, 4  ;;  %s25_s12 = sshll.u32 %s983_s11, 4  ;;  %s17_s10 = int_to_ptr.vmem [resolvable:$true] %s16_s10  ;;  %s1010_s12 = int_to_ptr.vmem [resolvable:$true] %s25_s12 }
   0x4   :  { %s910_s15 = scalar_lea.hbm %s1088_s0, 1024 }
   0x5   :  { %p911_p0 = scmp.ne.s32.totalorder %s1088_s0, %s910_s15  ;;  %p914_p1 = scmp.lt.u32.totalorder %s910_s15, %s1088_s0 }
   0x7   :  { %p916_p2 = pnand %p914_p1, %p911_p0 }
   0x9   :  { %919 = shalt.err (!%p916_p2)
}
   0xa   :  { %s920_s20 = scalar_lea.vmem %s17_s10, 1024  ;;  %p925_p4 = scmp.lt.s32.totalorder %s17_s10, %s17_s10 }
   0xb   :  { %p921_p3 = scmp.ne.s32.totalorder %s17_s10, %s920_s20  ;;  %p926_p5 = scmp.lt.s32.totalorder %s920_s20, %s920_s20 }
   0xd   :  { %p927_p6 = por %p926_p5, %p925_p4 }
   0xf   :  { %p928_p7 = pnand %p927_p6, %p921_p3 }
  0x11   :  { %931 = shalt.err (!%p928_p7)
}
  0x12   :  { %19 = dma.hbm_to_vmem [thread:$0]  %s1088_s0, 1024, %s17_s10, [#allocation3]  }
  0x13   :  { %s932_s25 = scalar_lea.hbm %s1089_s1, 16384 }
  0x14   :  { %p933_p8 = scmp.ne.s32.totalorder %s1089_s1, %s932_s25  ;;  %p936_p9 = scmp.lt.u32.totalorder %s932_s25, %s1089_s1 }
  0x16   :  { %p938_p10 = pnand %p936_p9, %p933_p8 }
  0x18   :  { %941 = shalt.err (!%p938_p10)
}
  0x19   :  { %s942_s30 = scalar_lea.vmem %s1010_s12, 16384  ;;  %p947_p12 = scmp.lt.s32.totalorder %s1010_s12, %s1010_s12 }
  0x1a   :  { %p943_p11 = scmp.ne.s32.totalorder %s1010_s12, %s942_s30  ;;  %p948_p13 = scmp.lt.s32.totalorder %s942_s30, %s942_s30 }
  0x1c   :  { %p949_p0 = por %p948_p13, %p947_p12 }
  0x1e   :  { %p950_p1 = pnand %p949_p0, %p943_p11 }
  0x20   :  { %953 = shalt.err (!%p950_p1)
}
  0x21   :  { %s984_s0 = smov 128   ;;  %s985_s3 = smov 8  }
  0x22   :  { %31 = dma.hbm_to_vmem [thread:$0]  %s1089_s1, 16384, %s1010_s12, [#allocation6], %s984_s0, %s984_s0, %s985_s3  }
  0x23   :  { %976 = dma.done.wait [#allocation3], 1024  }
  0x24   :  { %977 = vsyncadd [#allocation3], 4294966272 }
  0x25   :  { %978 = dma.done.wait [#allocation6], 16384  }
  0x26   :  { %979 = vsyncadd [#allocation6], 4294950912  ;;  %v62_v0 = vld [vmem:[#allocation5 + $0x80] sm:$0xff]  ;;  %v63_v1 = vld [vmem:[#allocation5 + $0x88] sm:$0xff]  ;;  %s986_s1 = smov 104   ;;  %s987_s6 = smov 120  }
  0x27   :  { %v94_v2 = vld [vmem:[#allocation5 + $0x180] sm:$0xff]  ;;  %v753_v3 = vpack.c.bf16 %v63_v1, %v62_v0  ;;  %v95_v4 = vld [vmem:[#allocation5 + $0x188] sm:$0xff]  ;;  %v64_v11 = vld [vmem:[#allocation5 + $0x90] sm:$0xff]  ;;  %s988_s7 = smov 112   ;;  %s989_s8 = smov 16   ;;  %vm477_vm0 = vcmask 130048  }
  0x28   :  { %v46_v5 = vld [vmem:[#allocation5] sm:$0xff]  ;;  %v47_v6 = vld [vmem:[#allocation5 + $0x8] sm:$0xff]  ;;  %v785_v7 = vpack.c.bf16 %v95_v4, %v94_v2  ;;  %v65_v13 = vld [vmem:[#allocation5 + $0x98] sm:$0xff]  ;;  %s990_s9 = smov 24   ;;  %s991_s10 = smov 64   ;;  %vm479_vm1 = vcmask 195584  }
  0x29   :  { %v755_v8 = vpack.c.bf16 %v47_v6, %v46_v5  ;;  %v78_v9 = vld [vmem:[#allocation5 + $0x100] sm:$0xff]  ;;  %v79_v10 = vld [vmem:[#allocation5 + $0x108] sm:$0xff]  ;;  %754 = vmatprep.subr.bf16.mxu0 %v753_v3  ;;  %v96_v14 = vld [vmem:[#allocation5 + $0x190] sm:$0xff]  ;;  %v757_v16 = vpack.c.bf16 %v65_v13, %v64_v11  ;;  %s992_s11 = smov 32   ;;  %vm476_vm2 = vcmask 64512   ;;  %s993_s12 = smov 96  }
  0x2a   :  { %v787_v12 = vpack.c.bf16 %v79_v10, %v78_v9  ;;  %v97_v15 = vld [vmem:[#allocation5 + $0x198] sm:$0xff]  ;;  %786 = vmatprep.subr.bf16.mxu1 %v785_v7  ;;  %v48_v18 = vld [vmem:[#allocation5 + $0x10] sm:$0xff]  ;;  %v66_v23 = vld [vmem:[#allocation5 + $0xa0] sm:$0xff]  ;;  %vm590_vm3 = vcmask 261120   ;;  %vm592_vm4 = vcmask 523264   ;;  %s994_s13 = smov [#allocation7]  }
  0x2b   :  { %756 = vmatpush3.bf16.msra.mxu0 %v755_v8  ;;  %v789_v17 = vpack.c.bf16 %v97_v15, %v96_v14  ;;  %v49_v19 = vld [vmem:[#allocation5 + $0x18] sm:$0xff]  ;;  %v80_v20 = vld [vmem:[#allocation5 + $0x110] sm:$0xff]  ;;  %v67_v24 = vld [vmem:[#allocation5 + $0xa8] sm:$0xff]  ;;  %s603_s14 = sshll.u32 %s994_s13, 4  ;;  %vm594_vm5 = vcmask 785408   ;;  %s604_s14 = int_to_ptr.vmem [resolvable:$true] %s603_s14 }
  0x2c   :  { %788 = vmatpush3.bf16.msra.mxu1 %v787_v12  ;;  %v759_v21 = vpack.c.bf16 %v49_v19, %v48_v18  ;;  %v81_v22 = vld [vmem:[#allocation5 + $0x118] sm:$0xff]  ;;  %758 = vmatprep.subr.bf16.mxu0 %v757_v16  ;;  %v761_v26 = vpack.c.bf16 %v67_v24, %v66_v23  ;;  %v98_v27 = vld [vmem:[#allocation5 + $0x1a0] sm:$0xff]  ;;  %v99_v28 = vld [vmem:[#allocation5 + $0x1a8] sm:$0xff]  ;;  %s954_s15 = scalar_lea.vmem %s604_s14, 128  ;;  %p959_p3 = scmp.lt.s32.totalorder %s604_s14, %s604_s14 }
  0x2d   :  { %790 = vmatprep.subr.bf16.mxu1 %v789_v17  ;;  %v791_v25 = vpack.c.bf16 %v81_v22, %v80_v20  ;;  %v50_v29 = vld [vmem:[#allocation5 + $0x20] sm:$0xff]  ;;  %v793_v30 = vpack.c.bf16 %v99_v28, %v98_v27  ;;  %v51_v31 = vld [vmem:[#allocation5 + $0x28] sm:$0xff]  ;;  %v68_v35 = vld [vmem:[#allocation5 + $0xb0] sm:$0xff]  ;;  %p955_p2 = scmp.ne.s32.totalorder %s604_s14, %s954_s15  ;;  %p960_p4 = scmp.lt.s32.totalorder %s954_s15, %s954_s15 }
  0x2e   :  { %v82_v32 = vld [vmem:[#allocation5 + $0x120] sm:$0xff]  ;;  %v83_v33 = vld [vmem:[#allocation5 + $0x128] sm:$0xff]  ;;  %v763_v34 = vpack.c.bf16 %v51_v31, %v50_v29  ;;  %v69_v36 = vld [vmem:[#allocation5 + $0xb8] sm:$0xff] }
  0x2f   :  { %760 = vmatpush3.bf16.msra.mxu0 %v759_v21  ;;  %v100_v37 = vld [vmem:[#allocation5 + $0x1b0] sm:$0xff]  ;;  %v795_v38 = vpack.c.bf16 %v83_v33, %v82_v32  ;;  %v765_v39 = vpack.c.bf16 %v69_v36, %v68_v35  ;;  %v101_v40 = vld [vmem:[#allocation5 + $0x1b8] sm:$0xff]  ;;  %v70_v46 = vld [vmem:[#allocation5 + $0xc0] sm:$0xff]  ;;  %p961_p5 = por %p960_p4, %p959_p3 }
  0x30   :  { %792 = vmatpush3.bf16.msra.mxu1 %v791_v25  ;;  %762 = vmatprep.subr.bf16.mxu0 %v761_v26  ;;  %v52_v41 = vld [vmem:[#allocation5 + $0x30] sm:$0xff]  ;;  %v53_v42 = vld [vmem:[#allocation5 + $0x38] sm:$0xff]  ;;  %v797_v43 = vpack.c.bf16 %v101_v40, %v100_v37  ;;  %v71_v47 = vld [vmem:[#allocation5 + $0xc8] sm:$0xff] }
  0x31   :  { %794 = vmatprep.subr.bf16.mxu1 %v793_v30  ;;  %v84_v44 = vld [vmem:[#allocation5 + $0x130] sm:$0xff]  ;;  %v85_v45 = vld [vmem:[#allocation5 + $0x138] sm:$0xff]  ;;  %v102_v48 = vld [vmem:[#allocation5 + $0x1c0] sm:$0xff]  ;;  %v767_v50 = vpack.c.bf16 %v53_v42, %v52_v41  ;;  %v769_v52 = vpack.c.bf16 %v71_v47, %v70_v46  ;;  %p962_p6 = pnand %p961_p5, %p955_p2 }
  0x32   :  { %v103_v49 = vld [vmem:[#allocation5 + $0x1c8] sm:$0xff]  ;;  %v799_v51 = vpack.c.bf16 %v85_v45, %v84_v44  ;;  %v54_v53 = vld [vmem:[#allocation5 + $0x40] sm:$0xff]  ;;  %v72_v58 = vld [vmem:[#allocation5 + $0xd0] sm:$0xff] }
  0x33   :  { %764 = vmatpush3.bf16.msra.mxu0 %v763_v34  ;;  %v55_v54 = vld [vmem:[#allocation5 + $0x48] sm:$0xff]  ;;  %v86_v55 = vld [vmem:[#allocation5 + $0x140] sm:$0xff]  ;;  %v801_v56 = vpack.c.bf16 %v103_v49, %v102_v48  ;;  %v73_v59 = vld [vmem:[#allocation5 + $0xd8] sm:$0xff] }
  0x34   :  { %796 = vmatpush3.bf16.msra.mxu1 %v795_v38  ;;  %766 = vmatprep.subr.bf16.mxu0 %v765_v39  ;;  %v87_v57 = vld [vmem:[#allocation5 + $0x148] sm:$0xff]  ;;  %v104_v60 = vld [vmem:[#allocation5 + $0x1d0] sm:$0xff]  ;;  %v105_v61 = vld [vmem:[#allocation5 + $0x1d8] sm:$0xff]  ;;  %v771_v62 = vpack.c.bf16 %v55_v54, %v54_v53  ;;  %v773_v0 = vpack.c.bf16 %v73_v59, %v72_v58 }
  0x35   :  { %798 = vmatprep.subr.bf16.mxu1 %v797_v43  ;;  %v803_v63 = vpack.c.bf16 %v87_v57, %v86_v55  ;;  %v56_v1 = vld [vmem:[#allocation5 + $0x50] sm:$0xff]  ;;  %v57_v2 = vld [vmem:[#allocation5 + $0x58] sm:$0xff]  ;;  %v805_v4 = vpack.c.bf16 %v105_v61, %v104_v60  ;;  %v74_v6 = vld [vmem:[#allocation5 + $0xe0] sm:$0xff] }
  0x36   :  { %v88_v3 = vld [vmem:[#allocation5 + $0x150] sm:$0xff]  ;;  %v89_v5 = vld [vmem:[#allocation5 + $0x158] sm:$0xff]  ;;  %v75_v7 = vld [vmem:[#allocation5 + $0xe8] sm:$0xff]  ;;  %v775_v10 = vpack.c.bf16 %v57_v2, %v56_v1 }
  0x37   :  { %768 = vmatpush3.bf16.msra.mxu0 %v767_v50  ;;  %v106_v8 = vld [vmem:[#allocation5 + $0x1e0] sm:$0xff]  ;;  %v107_v9 = vld [vmem:[#allocation5 + $0x1e8] sm:$0xff]  ;;  %v807_v13 = vpack.c.bf16 %v89_v5, %v88_v3  ;;  %v777_v14 = vpack.c.bf16 %v75_v7, %v74_v6  ;;  %v41_v17 = vld [vmem:[#allocation2 + $0x18] sm:$0xff] }
  0x38   :  { %800 = vmatpush3.bf16.msra.mxu1 %v799_v51  ;;  %770 = vmatprep.subr.bf16.mxu0 %v769_v52  ;;  %v58_v11 = vld [vmem:[#allocation5 + $0x60] sm:$0xff]  ;;  %v59_v12 = vld [vmem:[#allocation5 + $0x68] sm:$0xff]  ;;  %v809_v18 = vpack.c.bf16 %v107_v9, %v106_v8  ;;  %v76_v20 = vld [vmem:[#allocation5 + $0xf0] sm:$0xff] }
  0x39   :  { %802 = vmatprep.subr.bf16.mxu1 %v801_v56  ;;  %v90_v15 = vld [vmem:[#allocation5 + $0x160] sm:$0xff]  ;;  %v39_v16 = vld [vmem:[#allocation2 + $0x8] sm:$0xff]  ;;  %v77_v21 = vld [vmem:[#allocation5 + $0xf8] sm:$0xff]  ;;  %308 = vmatprep.mubr.f32.mxu1 %v41_v17  ;;  %v779_v24 = vpack.c.bf16 %v59_v12, %v58_v11 }
  0x3a   :  { %v91_v19 = vld [vmem:[#allocation5 + $0x168] sm:$0xff]  ;;  %238 = vmatprep.mubr.f32.mxu0 %v39_v16  ;;  %v108_v22 = vld [vmem:[#allocation5 + $0x1f0] sm:$0xff]  ;;  %v109_v23 = vld [vmem:[#allocation5 + $0x1f8] sm:$0xff]  ;;  %v781_v26 = vpack.c.bf16 %v77_v21, %v76_v20 }
  0x3b   :  { %772 = vmatpush3.bf16.msra.mxu0 %v771_v62  ;;  %v811_v25 = vpack.c.bf16 %v91_v19, %v90_v15  ;;  %v60_v27 = vld [vmem:[#allocation5 + $0x70] sm:$0xff]  ;;  %v61_v28 = vld [vmem:[#allocation5 + $0x78] sm:$0xff]  ;;  %v813_v30 = vpack.c.bf16 %v109_v23, %v108_v22  ;;  %v126_v32 = vld [vmem:[#allocation5 + $0x280] sm:$0xff] }
  0x3c   :  { %804 = vmatpush3.bf16.msra.mxu1 %v803_v63  ;;  %774 = vmatprep.subr.bf16.mxu0 %v773_v0  ;;  %v92_v29 = vld [vmem:[#allocation5 + $0x170] sm:$0xff]  ;;  %v93_v31 = vld [vmem:[#allocation5 + $0x178] sm:$0xff]  ;;  %v127_v33 = vld [vmem:[#allocation5 + $0x288] sm:$0xff]  ;;  %v783_v36 = vpack.c.bf16 %v61_v28, %v60_v27 }
  0x3d   :  { %806 = vmatprep.subr.bf16.mxu1 %v805_v4  ;;  %v158_v34 = vld [vmem:[#allocation5 + $0x380] sm:$0xff]  ;;  %v159_v35 = vld [vmem:[#allocation5 + $0x388] sm:$0xff]  ;;  %v815_v37 = vpack.c.bf16 %v93_v31, %v92_v29  ;;  %v817_v38 = vpack.c.bf16 %v127_v33, %v126_v32  ;;  %v128_v44 = vld [vmem:[#allocation5 + $0x290] sm:$0xff] }
  0x3e   :  { %v110_v39 = vld [vmem:[#allocation5 + $0x200] sm:$0xff]  ;;  %v111_v40 = vld [vmem:[#allocation5 + $0x208] sm:$0xff]  ;;  %v849_v42 = vpack.c.bf16 %v159_v35, %v158_v34  ;;  %v129_v45 = vld [vmem:[#allocation5 + $0x298] sm:$0xff] }
  0x3f   :  { %776 = vmatpush3.bf16.msra.mxu0 %v775_v10  ;;  %v142_v41 = vld [vmem:[#allocation5 + $0x300] sm:$0xff]  ;;  %v143_v43 = vld [vmem:[#allocation5 + $0x308] sm:$0xff]  ;;  %v160_v46 = vld [vmem:[#allocation5 + $0x390] sm:$0xff]  ;;  %v819_v50 = vpack.c.bf16 %v111_v40, %v110_v39  ;;  %v821_v52 = vpack.c.bf16 %v129_v45, %v128_v44 }
  0x40   :  { %808 = vmatpush3.bf16.msra.mxu1 %v807_v13  ;;  %778 = vmatprep.subr.bf16.mxu0 %v777_v14  ;;  %v161_v47 = vld [vmem:[#allocation5 + $0x398] sm:$0xff]  ;;  %v38_v48 = vld [vmem:[#allocation2] sm:$0xff]  ;;  %v40_v49 = vld [vmem:[#allocation2 + $0x10] sm:$0xff]  ;;  %v851_v51 = vpack.c.bf16 %v143_v43, %v142_v41 }
  0x41   :  { %810 = vmatprep.subr.bf16.mxu1 %v809_v18  ;;  %v112_v53 = vld [vmem:[#allocation5 + $0x210] sm:$0xff]  ;;  %v113_v54 = vld [vmem:[#allocation5 + $0x218] sm:$0xff]  ;;  %v853_v56 = vpack.c.bf16 %v161_v47, %v160_v46  ;;  %v130_v58 = vld [vmem:[#allocation5 + $0x2a0] sm:$0xff] }
  0x42   :  { %v144_v55 = vld [vmem:[#allocation5 + $0x310] sm:$0xff]  ;;  %v145_v57 = vld [vmem:[#allocation5 + $0x318] sm:$0xff]  ;;  %v131_v59 = vld [vmem:[#allocation5 + $0x2a8] sm:$0xff]  ;;  %v823_v62 = vpack.c.bf16 %v113_v54, %v112_v53 }
  0x43   :  { %780 = vmatpush3.bf16.msra.mxu0 %v779_v24  ;;  %v162_v60 = vld [vmem:[#allocation5 + $0x3a0] sm:$0xff]  ;;  %v163_v61 = vld [vmem:[#allocation5 + $0x3a8] sm:$0xff]  ;;  %v855_v63 = vpack.c.bf16 %v145_v57, %v144_v55  ;;  %v825_v0 = vpack.c.bf16 %v131_v59, %v130_v58  ;;  %v132_v6 = vld [vmem:[#allocation5 + $0x2b0] sm:$0xff] }
  0x44   :  { %812 = vmatpush3.bf16.msra.mxu1 %v811_v25  ;;  %782 = vmatprep.subr.bf16.mxu0 %v781_v26  ;;  %v114_v1 = vld [vmem:[#allocation5 + $0x220] sm:$0xff]  ;;  %v115_v2 = vld [vmem:[#allocation5 + $0x228] sm:$0xff]  ;;  %v857_v4 = vpack.c.bf16 %v163_v61, %v162_v60  ;;  %v133_v7 = vld [vmem:[#allocation5 + $0x2b8] sm:$0xff] }
  0x45   :  { %814 = vmatprep.subr.bf16.mxu1 %v813_v30  ;;  %v146_v3 = vld [vmem:[#allocation5 + $0x320] sm:$0xff]  ;;  %v147_v5 = vld [vmem:[#allocation5 + $0x328] sm:$0xff]  ;;  %v164_v8 = vld [vmem:[#allocation5 + $0x3b0] sm:$0xff]  ;;  %v827_v10 = vpack.c.bf16 %v115_v2, %v114_v1  ;;  %v829_v12 = vpack.c.bf16 %v133_v7, %v132_v6 }
  0x46   :  { %v165_v9 = vld [vmem:[#allocation5 + $0x3b8] sm:$0xff]  ;;  %v859_v11 = vpack.c.bf16 %v147_v5, %v146_v3  ;;  %v116_v13 = vld [vmem:[#allocation5 + $0x230] sm:$0xff]  ;;  %v134_v18 = vld [vmem:[#allocation5 + $0x2c0] sm:$0xff] }
  0x47   :  { %784 = vmatpush3.bf16.msra.mxu0 %v783_v36  ;;  %v117_v14 = vld [vmem:[#allocation5 + $0x238] sm:$0xff]  ;;  %v148_v15 = vld [vmem:[#allocation5 + $0x330] sm:$0xff]  ;;  %v861_v16 = vpack.c.bf16 %v165_v9, %v164_v8  ;;  %v135_v19 = vld [vmem:[#allocation5 + $0x2c8] sm:$0xff] }
  0x48   :  { %816 = vmatpush3.bf16.msra.mxu1 %v815_v37  ;;  %818 = vmatprep.subr.bf16.mxu0 %v817_v38  ;;  %v149_v17 = vld [vmem:[#allocation5 + $0x338] sm:$0xff]  ;;  %v166_v20 = vld [vmem:[#allocation5 + $0x3c0] sm:$0xff]  ;;  %v167_v21 = vld [vmem:[#allocation5 + $0x3c8] sm:$0xff]  ;;  %v831_v22 = vpack.c.bf16 %v117_v14, %v116_v13  ;;  %v833_v26 = vpack.c.bf16 %v135_v19, %v134_v18 }
  0x49   :  { %850 = vmatprep.subr.bf16.mxu1 %v849_v42  ;;  %v43_v23 = vld [vmem:[#allocation2 + $0x28] sm:$0xff]  ;;  %v45_v24 = vld [vmem:[#allocation2 + $0x38] sm:$0xff]  ;;  %v863_v25 = vpack.c.bf16 %v149_v17, %v148_v15  ;;  %v118_v27 = vld [vmem:[#allocation5 + $0x240] sm:$0xff]  ;;  %v865_v30 = vpack.c.bf16 %v167_v21, %v166_v20 }
  0x4a   :  { %239 = vmatmul.mubr.f32.vlgmr.msra.gmra.mrb[0].mxu0 %v38_v48  ;;  %v119_v28 = vld [vmem:[#allocation5 + $0x248] sm:$0xff]  ;;  %v150_v29 = vld [vmem:[#allocation5 + $0x340] sm:$0xff]  ;;  %v136_v32 = vld [vmem:[#allocation5 + $0x2d0] sm:$0xff] }
  0x4b   :  { %309 = vmatmul.mubr.f32.vlgmr.msra.gmra.mrb[0].mxu1 %v40_v49  ;;  %820 = vmatpush3.bf16.msra.mxu0 %v819_v50  ;;  %v151_v31 = vld [vmem:[#allocation5 + $0x348] sm:$0xff]  ;;  %v137_v33 = vld [vmem:[#allocation5 + $0x2d8] sm:$0xff]  ;;  %v168_v34 = vld [vmem:[#allocation5 + $0x3d0] sm:$0xff]  ;;  %v835_v36 = vpack.c.bf16 %v119_v28, %v118_v27 }
  0x4c   :  { %852 = vmatpush3.bf16.msra.mxu1 %v851_v51  ;;  %822 = vmatprep.subr.bf16.mxu0 %v821_v52  ;;  %v169_v35 = vld [vmem:[#allocation5 + $0x3d8] sm:$0xff]  ;;  %v867_v37 = vpack.c.bf16 %v151_v31, %v150_v29  ;;  %v837_v38 = vpack.c.bf16 %v137_v33, %v136_v32  ;;  %v120_v39 = vld [vmem:[#allocation5 + $0x250] sm:$0xff]  ;;  %v138_v44 = vld [vmem:[#allocation5 + $0x2e0] sm:$0xff] }
  0x4d   :  { %854 = vmatprep.subr.bf16.mxu1 %v853_v56  ;;  %378 = vmatprep.mubr.f32.mxu0 %v43_v23  ;;  %v121_v40 = vld [vmem:[#allocation5 + $0x258] sm:$0xff]  ;;  %v152_v41 = vld [vmem:[#allocation5 + $0x350] sm:$0xff]  ;;  %v869_v42 = vpack.c.bf16 %v169_v35, %v168_v34  ;;  %v139_v45 = vld [vmem:[#allocation5 + $0x2e8] sm:$0xff] }
  0x4e   :  { %448 = vmatprep.mubr.f32.mxu1 %v45_v24  ;;  %v153_v43 = vld [vmem:[#allocation5 + $0x358] sm:$0xff]  ;;  %v170_v46 = vld [vmem:[#allocation5 + $0x3e0] sm:$0xff]  ;;  %v171_v47 = vld [vmem:[#allocation5 + $0x3e8] sm:$0xff]  ;;  %v839_v48 = vpack.c.bf16 %v121_v40, %v120_v39  ;;  %v841_v50 = vpack.c.bf16 %v139_v45, %v138_v44 }
  0x4f   :  { %824 = vmatpush3.bf16.msra.mxu0 %v823_v62  ;;  %v871_v49 = vpack.c.bf16 %v153_v43, %v152_v41  ;;  %v122_v51 = vld [vmem:[#allocation5 + $0x260] sm:$0xff]  ;;  %v123_v52 = vld [vmem:[#allocation5 + $0x268] sm:$0xff]  ;;  %v873_v54 = vpack.c.bf16 %v171_v47, %v170_v46  ;;  %v140_v56 = vld [vmem:[#allocation5 + $0x2f0] sm:$0xff] }
  0x50   :  { %856 = vmatpush3.bf16.msra.mxu1 %v855_v63  ;;  %826 = vmatprep.subr.bf16.mxu0 %v825_v0  ;;  %v154_v53 = vld [vmem:[#allocation5 + $0x360] sm:$0xff]  ;;  %v155_v55 = vld [vmem:[#allocation5 + $0x368] sm:$0xff]  ;;  %v141_v57 = vld [vmem:[#allocation5 + $0x2f8] sm:$0xff]  ;;  %v843_v60 = vpack.c.bf16 %v123_v52, %v122_v51 }
  0x51   :  { %858 = vmatprep.subr.bf16.mxu1 %v857_v4  ;;  %v172_v58 = vld [vmem:[#allocation5 + $0x3f0] sm:$0xff]  ;;  %v173_v59 = vld [vmem:[#allocation5 + $0x3f8] sm:$0xff]  ;;  %v875_v61 = vpack.c.bf16 %v155_v55, %v154_v53  ;;  %v845_v62 = vpack.c.bf16 %v141_v57, %v140_v56  ;;  %v42_v6 = vld [vmem:[#allocation2 + $0x20] sm:$0xff] }
  0x52   :  { %v124_v63 = vld [vmem:[#allocation5 + $0x270] sm:$0xff]  ;;  %v125_v0 = vld [vmem:[#allocation5 + $0x278] sm:$0xff]  ;;  %v877_v1 = vpack.c.bf16 %v173_v59, %v172_v58 }
  0x53   :  { %828 = vmatpush3.bf16.msra.mxu0 %v827_v10  ;;  %v156_v2 = vld [vmem:[#allocation5 + $0x370] sm:$0xff]  ;;  %v157_v3 = vld [vmem:[#allocation5 + $0x378] sm:$0xff]  ;;  %v847_v4 = vpack.c.bf16 %v125_v0, %v124_v63 }
  0x54   :  { %860 = vmatpush3.bf16.msra.mxu1 %v859_v11  ;;  %830 = vmatprep.subr.bf16.mxu0 %v829_v12  ;;  %v879_v5 = vpack.c.bf16 %v157_v3, %v156_v2  ;;  %v44_v7 = vld [vmem:[#allocation2 + $0x30] sm:$0xff] }
  0x55   :  { %862 = vmatprep.subr.bf16.mxu1 %v861_v16 }
  0x57   :  { %832 = vmatpush3.bf16.msra.mxu0 %v831_v22 }
  0x58   :  { %864 = vmatpush3.bf16.msra.mxu1 %v863_v25  ;;  %834 = vmatprep.subr.bf16.mxu0 %v833_v26 }
  0x59   :  { %866 = vmatprep.subr.bf16.mxu1 %v865_v30 }
  0x5b   :  { %836 = vmatpush3.bf16.msra.mxu0 %v835_v36 }
  0x5c   :  { %868 = vmatpush3.bf16.msra.mxu1 %v867_v37  ;;  %838 = vmatprep.subr.bf16.mxu0 %v837_v38 }
  0x5d   :  { %870 = vmatprep.subr.bf16.mxu1 %v869_v42 }
  0x5f   :  { %840 = vmatpush3.bf16.msra.mxu0 %v839_v48 }
  0x60   :  { %872 = vmatpush3.bf16.msra.mxu1 %v871_v49  ;;  %842 = vmatprep.subr.bf16.mxu0 %v841_v50 }
  0x61   :  { %874 = vmatprep.subr.bf16.mxu1 %v873_v54 }
  0x63   :  { %844 = vmatpush3.bf16.msra.mxu0 %v843_v60 }
  0x64   :  { %876 = vmatpush3.bf16.msra.mxu1 %v875_v61  ;;  %846 = vmatprep.subr.bf16.mxu0 %v845_v62 }
  0x65   :  { %878 = vmatprep.subr.bf16.mxu1 %v877_v1 }
  0x67   :  { %848 = vmatpush3.bf16.msra.mxu0 %v847_v4 }
  0x68   :  { %880 = vmatpush3.bf16.msra.mxu1 %v879_v5 }
  0x6a   :  { %379 = vmatmul.mubr.f32.vlgmr.msra.gmra.mrb[2].mxu0 %v42_v6 }
  0x6b   :  { %449 = vmatmul.mubr.f32.vlgmr.msra.gmra.mrb[2].mxu1 %v44_v7 }
 0x11d   :  { %v645_v8 = vpop.f32.mrb[0].mxu0 }
 0x11e   :  { %v680_v9 = vpop.f32.mrb[0].mxu1  ;;  %v646_v10 = vpop.f32.mrb[1].mxu0 }
 0x11f   :  { %v647_v11 = vadd.f32 %v646_v10, %v645_v8  ;;  %v681_v12 = vpop.f32.mrb[1].mxu1 }
 0x120   :  { %v682_v13 = vadd.f32 %v681_v12, %v680_v9 }
 0x122   :  { %v311_v14 = vadd.f32 %v682_v13, %v647_v11 }
 0x13d   :  { %v715_v15 = vpop.f32.mrb[2].mxu0 }
 0x13e   :  { %v716_v16 = vpop.f32.mrb[3].mxu0  ;;  %v750_v17 = vpop.f32.mrb[2].mxu1 }
 0x13f   :  { %v717_v18 = vadd.f32 %v716_v16, %v715_v15  ;;  %v751_v19 = vpop.f32.mrb[3].mxu1 }
 0x140   :  { %v752_v20 = vadd.f32 %v751_v19, %v750_v17 }
 0x141   :  { %v381_v21 = vadd.f32 %v717_v18, %v311_v14 }
 0x143   :  { %v1042_v22 = vadd.f32 %v752_v20, %v381_v21 }
 0x145   :  { %495 = vrot.lane.b32.xlu1 %v1042_v22, %s986_s1  ;;  %487 = vrot.lane.b32.xlu0 %v1042_v22, %s987_s6  ;;  %v454_v38 = vand.u32 2147483647, %v1042_v22  ;;  %v464_v13 = vmul.f32 0.1, %v1042_v22 }
 0x147   :  { %v457_v41 = vadd.f32 2.0, %v454_v38  ;;  %v455_v45 = vmul.f32 2.0, %v454_v38 }
 0x149   :  { %491 = vrot.lane.b32.xlu0 %v1042_v22, %s988_s7  ;;  %v456_v50 = vadd.f32 4.0, %v455_v45 }
 0x1b7   :  { %v488_v23 = vpop.permute.xlu0 %487  ;;  %v496_v27 = vpop.permute.xlu1 %495 }
 0x1b8   :  { %v490_v24 = vmax.f32 %v1042_v22, %v488_v23 }
 0x1bb   :  { %v492_v25 = vpop.permute.xlu0 %491 }
 0x1bc   :  { %v494_v26 = vmax.f32 %v490_v24, %v492_v25 }
 0x1be   :  { %v498_v28 = vmax.f32 %v494_v26, %v496_v27 }
 0x1c0   :  { %509 = vrot.lane.b32.xlu0 %v498_v28, %s989_s8  ;;  %503 = vrot.lane.b32.xlu1 %v498_v28, %s985_s3  ;;  %v499_v43 = vsub.f32 %v1042_v22, %v498_v28 }
 0x1c2   :  { %v500_v44 = vmul.f32 1.442695, %v499_v43 }
 0x1c4   :  { %515 = vrot.lane.b32.xlu1 %v498_v28, %s990_s9 }
 0x232   :  { %v510_v29 = vpop.permute.xlu0 %509  ;;  %v504_v30 = vpop.permute.xlu1 %503 }
 0x233   :  { %v512_v31 = vsub.f32 %v1042_v22, %v510_v29  ;;  %v506_v32 = vsub.f32 %v1042_v22, %v504_v30 }
 0x235   :  { %v513_v33 = vmul.f32 1.442695, %v512_v31  ;;  %v507_v34 = vmul.f32 1.442695, %v506_v32 }
 0x236   :  { %v516_v35 = vpop.permute.xlu1 %515 }
 0x237   :  { %894 = vpow2.f32 %v513_v33  ;;  %v518_v36 = vsub.f32 %v1042_v22, %v516_v35 }
 0x238   :  { %896 = vpow2.f32 %v507_v34 }
 0x239   :  { %v519_v37 = vmul.f32 1.442695, %v518_v36 }
 0x23b   :  { %898 = vpow2.f32 %v519_v37 }
 0x23c   :  { %900 = vpow2.f32 %v500_v44 }
 0x241   :  { %v895_v39 = vpop.eup %894 }
 0x242   :  { %v897_v40 = vpop.eup %896  ;;  %527 = vrot.lane.b32.xlu1 %v895_v39, %s988_s7 }
 0x243   :  { %522 = vrot.lane.b32.xlu0 %v897_v40, %s987_s6 }
 0x245   :  { %v899_v42 = vpop.eup %898 }
 0x246   :  { %459 = vrot.lane.b32.xlu1 %v457_v41, %s988_s7  ;;  %v901_v47 = vpop.eup %900 }
 0x247   :  { %532 = vrot.lane.b32.xlu0 %v899_v42, %s986_s1 }
 0x2b4   :  { %v528_v46 = vpop.permute.xlu1 %527 }
 0x2b5   :  { %v523_v48 = vpop.permute.xlu0 %522 }
 0x2b6   :  { %v525_v49 = vadd.f32 %v901_v47, %v523_v48 }
 0x2b8   :  { %v530_v51 = vadd.f32 %v528_v46, %v525_v49  ;;  %v460_v52 = vpop.permute.xlu1 %459 }
 0x2b9   :  { %v533_v53 = vpop.permute.xlu0 %532  ;;  %v463_v54 = vadd.f32 %v460_v52, %v456_v50  ;;  %v462_v61 = vsub.f32 %v456_v50, %v460_v52 }
 0x2ba   :  { %v535_v55 = vadd.f32 %v533_v53, %v530_v51 }
 0x2bb   :  { %v469_v56 = vmul.f32 16.0, %v463_v54  ;;  %v465_v62 = vmul.f32 16.0, %v462_v61 }
 0x2bc   :  { %902 = vrcp.f32 %v535_v55  ;;  %539 = vrot.lane.b32.xlu0 %v535_v55, %s985_s3  ;;  %544 = vrot.lane.b32.xlu1 %v535_v55, %s989_s8 }
 0x2bd   :  { %v470_v57 = vceil.f32 %v469_v56  ;;  %v466_v63 = vfloor.f32 %v465_v62 }
 0x2bf   :  { %v471_v58 = vmul.f32 0.0625, %v470_v57  ;;  %v468_v2 = vmul.f32 0.0625, %v466_v63 }
 0x2c0   :  { %549 = vrot.lane.b32.xlu0 %v535_v55, %s990_s9 }
 0x2c1   :  { %473 = vrot.lane.b32.xlu1 %v471_v58, %s989_s8 }
 0x2c6   :  { %v903_v59 = vpop.eup %902 }
 0x2c7   :  { %v537_v60 = vmul.f32 %v903_v59, %v901_v47 }
 0x2c9   :  { %555 = vrot.lane.b32.xlu1 %v537_v60, %s991_s10 }
 0x32e   :  { %v540_v0 = vpop.permute.xlu0 %539  ;;  %v545_v1 = vpop.permute.xlu1 %544 }
 0x32f   :  { %904 = vrcp.f32 %v540_v0 }
 0x330   :  { %906 = vrcp.f32 %v545_v1 }
 0x332   :  { %v550_v3 = vpop.permute.xlu0 %549 }
 0x333   :  { %908 = vrcp.f32 %v550_v3  ;;  %v474_v4 = vpop.permute.xlu1 %473 }
 0x334   :  { %v478_v5 = vsel %vm477_vm0, %v468_v2, %v474_v4 }
 0x335   :  { %v480_v6 = vsel %vm479_vm1, %v478_v5, %v474_v4 }
 0x336   :  { %482 = vrot.lane.b32.xlu0 %v480_v6, %s992_s11 }
 0x339   :  { %v905_v7 = vpop.eup %904 }
 0x33a   :  { %v907_v8 = vpop.eup %906  ;;  %v543_v9 = vmul.f32 %v905_v7, %v897_v40 }
 0x33b   :  { %v548_v10 = vmul.f32 %v907_v8, %v895_v39  ;;  %v556_v16 = vpop.permute.xlu1 %555 }
 0x33c   :  { %559 = vrot.lane.b32.xlu0 %v543_v9, %s991_s10 }
 0x33d   :  { %v909_v11 = vpop.eup %908  ;;  %563 = vrot.lane.b32.xlu1 %v548_v10, %s991_s10 }
 0x33e   :  { %v553_v12 = vmul.f32 %v909_v11, %v899_v42 }
 0x340   :  { %567 = vrot.lane.b32.xlu0 %v553_v12, %s991_s10 }
 0x341   :  { %574 = vrot.lane.b32.xlu1 %v463_v54, %s989_s8 }
 0x344   :  { %579 = vrot.lane.b32.xlu0 %v1042_v22, %s991_s10 }
 0x3a8   :  { %v483_v14 = vpop.permute.xlu0 %482 }
 0x3a9   :  { %v485_v15 = vadd.f32 %v483_v14, %v464_v13 }
 0x3ab   :  { %583 = vrot.lane.b32.xlu1 %v485_v15, %s992_s11 }
 0x3ae   :  { %v560_v17 = vpop.permute.xlu0 %559 }
 0x3af   :  { %v564_v18 = vpop.permute.xlu1 %563  ;;  %v570_v19 = vsel %vm476_vm2, %v556_v16, %v560_v17 }
 0x3b0   :  { %v571_v21 = vsel %vm477_vm0, %v570_v19, %v564_v18 }
 0x3b2   :  { %v568_v20 = vpop.permute.xlu0 %567 }
 0x3b3   :  { %v572_v23 = vsel %vm479_vm1, %v571_v21, %v568_v20  ;;  %v575_v24 = vpop.permute.xlu1 %574 }
 0x3b4   :  { %587 = vrot.lane.b32.xlu0 %v572_v23, %s993_s12  ;;  %v577_v25 = vsel %vm477_vm0, %v462_v61, %v575_v24 }
 0x3b5   :  { %v578_v27 = vsel %vm479_vm1, %v577_v25, %v575_v24 }
 0x3b6   :  { %v580_v22 = vpop.permute.xlu0 %579 }
 0x3b7   :  { %v591_v28 = vsel %vm590_vm3, %v578_v27, %v580_v22 }
 0x41d   :  { %v584_v26 = vpop.permute.xlu1 %583 }
 0x41e   :  { %v593_v29 = vsel %vm592_vm4, %v591_v28, %v584_v26 }
 0x426   :  { %v588_v30 = vpop.permute.xlu0 %587 }
 0x427   :  { %v595_v31 = vsel %vm594_vm5, %v593_v29, %v588_v30 }
 0x428   :  { %596 = vst [vmem:[#allocation7] sm:$0xff] %v595_v31 }
 0x429   :  { %965 = shalt.err (!%p962_p6)
}
 0x42a   :  { %s966_s18 = scalar_lea.hbm %s1090_s2, 128 }
 0x42b   :  { %p967_p7 = scmp.ne.s32.totalorder %s1090_s2, %s966_s18  ;;  %p970_p8 = scmp.lt.u32.totalorder %s966_s18, %s1090_s2 }
 0x42d   :  { %p972_p9 = pnand %p970_p8, %p967_p7 }
 0x42f   :  { %975 = shalt.err (!%p972_p9)
}
 0x430   :  { %606 = dma.vmem_to_hbm [thread:$0]  %s604_s14, 128, %s1090_s2, [#allocation4]  }
 0x431   :  { %980 = dma.done.wait [#allocation4], 128  }
 0x432   :  { %981 = vsyncadd [#allocation4], 4294967168 }
 0x433   :  { %610 = vsyncpa [#allocation3], 1 }
 0x434   :  { %611 = vsyncpa [#allocation6], 1 }
 0x435   :  { %612 = vsyncpa [#allocation4], 1 }

</bundles_post_ra>
